<compile_context>
chip_gen: v6e
topology: v6e:2x2x1
jax: 0.10.0
libtpu: 0.0.40
codegen_flags: <defaults>
</compile_context>

<pallas_src>
import jax
import jax.numpy as jnp
from jax.experimental import pallas as pl
from jax.experimental.pallas import tpu as pltpu


def _round_up(x, m):
    return ((x + m - 1) // m) * m


def attention_kernel(all_ref, l_ref, bias_ref, w1_ref, w3_ref, out_ref):
    # all_ref : (TB, S, H) bf16   all_memory block (dominant stream)
    # l_ref   : (TB, H)    f32    last_memory @ W2^T (hoisted to the wrapper)
    # bias_ref: (TB, S)    bf16   additive mask bias (0 keep / -1e9 drop), lane-dense S
    # w1_ref  : (H, H)     bf16   W1^T (x @ W1^T semantics)
    # w3_ref  : (1, H)     f32    W3 as a row vector
    # out_ref : (TB, H)    f32
    tb, s, h = all_ref.shape
    all_mem = all_ref[...]                                             # (TB,S,H) bf16

    # --- h = tanh(all_mem @ W1^T + last_mem @ W2^T) --------------------------
    # One (TB*S, H) @ (H, H) MXU push per grid step; bf16 operands, f32 acc.
    a = jnp.dot(all_mem.reshape(tb * s, h), w1_ref[...],
                preferred_element_type=jnp.float32).reshape(tb, s, h)
    hact = jnp.tanh(a + l_ref[...].reshape(tb, 1, h))                  # (TB,S,H) f32

    # --- logits = h @ W3^T  (VPU mul + lane reduce over H; no N=1 matmul) ----
    # b3 is dropped: softmax is shift-invariant, so it cannot change the output.
    w3 = w3_ref[...].reshape(1, 1, h)
    logits = jnp.sum(hact * w3, axis=-1)                               # (TB,S) f32
    logits = logits + bias_ref[...].astype(jnp.float32)                # additive mask

    # --- softmax over S (S on the lane axis); normalize after PV -------------
    m = jnp.max(logits, axis=-1, keepdims=True)                        # (TB,1)
    e = jnp.exp(logits - m)                                            # (TB,S)
    denom = jnp.sum(e, axis=-1, keepdims=True)                         # (TB,1)

    # --- unnormalized PV on the MXU: (TB,1,S) @ (TB,S,H) -> (TB,1,H) ---------
    out_un = jnp.einsum("bqs,bsh->bqh",
                        e.astype(all_mem.dtype).reshape(tb, 1, s), all_mem,
                        preferred_element_type=jnp.float32)
    # Exact normalization (TB*H divides, off the MXU/DMA critical path).
    out_ref[...] = out_un.reshape(tb, h) / denom


def _pick_batch_block(B, S_pad, H, budget_bytes, target_steps=4):
    """Largest multiple-of-8 TB whose buffers + live intermediates fit budget,
    capped so the grid keeps ~target_steps steps when B allows it."""
    b_ceil = _round_up(max(B, 1), 8)
    tb_step_cap = max(8, _round_up(-(-b_ceil // target_steps), 8))
    best, tb = 8, 8
    while tb <= min(b_ceil, tb_step_cap):
        streamed = tb * S_pad * H * 2 + tb * S_pad * 2 + tb * H * 4 + tb * H * 4
        weights = H * H * 2 + 8 * H * 4
        live = 2 * tb * S_pad * H * 4 + 2 * tb * S_pad * 4   # a + hact + logits/e (f32)
        total = 2 * streamed + 2 * weights + live            # double-buffered streams
        if total <= budget_bytes:
            best = tb
            tb *= 2
        else:
            break
    return best


def attention_forward(all_memory, last_memory, mask, params, tb=None,
                      vmem_budget_bytes=24 * 1024 * 1024):
    B, S, H = all_memory.shape
    f32, bf16 = jnp.float32, jnp.bfloat16

    # S padded to a sublane multiple so reshape(TB*S, H) in the kernel is
    # layout-free; the padded rows carry a -1e9 bias and die in the softmax.
    S_pad = _round_up(S, 8)

    if tb is None:
        tb = _pick_batch_block(B, S_pad, H, vmem_budget_bytes)
    tb = max(8, _round_up(tb, 8))            # sublane-dense (TB,H)/(TB,S) blocks
    B_pad = _round_up(B, tb)                 # no silently dropped tail batches
    grid = (B_pad // tb,)

    # --- wrapper-side prep (tiny vs the all_memory stream) -------------------
    # last_memory @ W2^T: one fused XLA matmul over the whole batch, f32.
    l = last_memory[:, 0, :].astype(f32) @ params["W2"].T.astype(f32)   # (B, H)
    l_p = jnp.zeros((B_pad, H), f32).at[:B, :].set(l)

    # all_memory streamed in bf16; f32 accumulation happens in the kernel.
    all_p = jnp.zeros((B_pad, S_pad, H), bf16).at[:B, :S, :].set(
        all_memory.astype(bf16))

    # Additive mask bias: 0 = keep, -1e9 = drop; every padded row/col is dropped.
    if mask is None:
        bias_real = jnp.zeros((B, S), f32)
    else:
        bias_real = jnp.where(mask, jnp.float32(-1e9), jnp.float32(0.0))
    bias_p = jnp.full((B_pad, S_pad), -1e9, f32).at[:B, :S].set(bias_real)
    bias_p = bias_p.astype(bf16)

    w1_t = params["W1"].T.astype(bf16)                   # (H, H): x @ W1^T
    w3_row = params["W3"].astype(f32).reshape(1, H)      # (1, H)

    out = pl.pallas_call(
        attention_kernel,
        out_shape=jax.ShapeDtypeStruct((B_pad, H), f32),
        grid_spec=pltpu.PrefetchScalarGridSpec(
            num_scalar_prefetch=0,
            grid=grid,
            in_specs=[
                pl.BlockSpec((tb, S_pad, H), lambda b: (b, 0, 0)),   # all_memory (bf16)
                pl.BlockSpec((tb, H), lambda b: (b, 0)),             # last_mem @ W2^T
                pl.BlockSpec((tb, S_pad), lambda b: (b, 0)),         # mask bias (bf16)
                pl.BlockSpec((H, H), lambda b: (0, 0)),              # W1^T (constant)
                pl.BlockSpec((1, H), lambda b: (0, 0)),              # W3 row (constant)
            ],
            out_specs=pl.BlockSpec((tb, H), lambda b: (b, 0)),
        ),
        compiler_params=pltpu.CompilerParams(
            dimension_semantics=("parallel",),   # lets v7x shard blocks over 2 TCs
            vmem_limit_bytes=40 * 1024 * 1024,   # safe on v7x (64 MiB) / v5e / v6e
        ),
    )(all_p, l_p, bias_p, w1_t, w3_row)
    return out[:B]                                        # (B, H)


def attention_reference(all_memory, last_memory, mask, params):
    a = all_memory @ params["W1"].T
    l = last_memory @ params["W2"].T
    h = jnp.tanh(a + l)
    logits = (h @ params["W3"].T)[..., 0] + params["b3"][0]           # (B, S)
    if mask is not None:
        logits = jnp.where(mask, -1e9, logits)
    attn = jax.nn.softmax(logits, axis=1)
    return jnp.sum(attn[..., None] * all_memory, axis=1)              # (B, H)


if __name__ == "__main__":
    B, S, H = 2, 8, 32
    key = jax.random.PRNGKey(0)
    k_all, k_last, k_w1, k_w2, k_w3, k_b3 = jax.random.split(key, 6)

    all_memory = jax.random.normal(k_all, (B, S, H), dtype=jnp.float32)
    last_memory = jax.random.normal(k_last, (B, 1, H), dtype=jnp.float32)
    # mask: True = position is masked out (matches torch masked_fill_ semantics)
    mask = jnp.zeros((B, S), dtype=bool).at[:, S - 2:].set(True)

    bound = 1.0 / (H ** 0.5)
    params = {
        "W1": jax.random.uniform(k_w1, (H, H), jnp.float32, -bound, bound),
        "W2": jax.random.uniform(k_w2, (H, H), jnp.float32, -bound, bound),
        "W3": jax.random.uniform(k_w3, (1, H), jnp.float32, -bound, bound),
        "b3": jax.random.uniform(k_b3, (1,), jnp.float32, -bound, bound),
    }

    out = attention_forward(all_memory, last_memory, mask, params)
    out = jax.block_until_ready(out)

    ref = attention_reference(all_memory, last_memory, mask, params)
    assert out.shape == (B, H)
    # Tolerance reflects bf16 streaming of all_memory/W1 (f32 accumulation);
    # the softmax normalization itself is now an exact f32 divide.
    assert jnp.allclose(out, ref, atol=3e-2, rtol=3e-2), "mismatch vs reference"
    print("KERNEL_OK")
</pallas_src>

<mosaic_0001>
module attributes {stable_mosaic.version = 11 : i64} {
  func.func @attention_kernel(%arg0: i32, %arg1: memref<8x8x32xbf16, #tpu.memory_space<vmem>>, %arg2: memref<8x32xf32, #tpu.memory_space<vmem>>, %arg3: memref<8x8xbf16, #tpu.memory_space<vmem>>, %arg4: memref<32x32xbf16, #tpu.memory_space<vmem>>, %arg5: memref<1x32xf32, #tpu.memory_space<vmem>>, %arg6: memref<8x32xf32, #tpu.memory_space<vmem>>) attributes {dimension_semantics = [#tpu.dimension_semantics<parallel>], iteration_bounds = array<i64: 1>, scalar_prefetch = 0 : i64, scratch_operands = 0 : i64, tpu.core_type = #tpu.core_type<tc>, window_params = [{transform_indices = @transform_0, window_bounds = array<i64: 8, 8, 32>}, {transform_indices = @transform_1, window_bounds = array<i64: 8, 32>}, {transform_indices = @transform_2, window_bounds = array<i64: 8, 8>}, {pipeline_mode = #tpu.pipeline_mode<synchronous>, transform_indices = @transform_3, window_bounds = array<i64: 32, 32>}, {pipeline_mode = #tpu.pipeline_mode<synchronous>, transform_indices = @transform_4, window_bounds = array<i64: 1, 32>}, {transform_indices = @transform_5, window_bounds = array<i64: 8, 32>}]} {
    %c0 = arith.constant 0 : index
    %c0_0 = arith.constant 0 : index
    %c0_1 = arith.constant 0 : index
    %0 = vector.load %arg1[%c0, %c0_0, %c0_1] : memref<8x8x32xbf16, #tpu.memory_space<vmem>>, vector<8x8x32xbf16>
    %1 = vector.shape_cast %0 : vector<8x8x32xbf16> to vector<64x32xbf16>
    %c0_2 = arith.constant 0 : index
    %c0_3 = arith.constant 0 : index
    %2 = vector.load %arg4[%c0_2, %c0_3] : memref<32x32xbf16, #tpu.memory_space<vmem>>, vector<32x32xbf16>
    %cst = arith.constant dense<0.000000e+00> : vector<64x32xf32>
    %3 = tpu.matmul %1, %2, %cst {dimension_numbers = #tpu.dot_dimension_numbers<[1], [0], [0], [1], [0, 0, 1, 1], [], []>} : vector<64x32xbf16>, vector<32x32xbf16>, vector<64x32xf32> -> vector<64x32xf32>
    %4 = vector.shape_cast %3 : vector<64x32xf32> to vector<8x8x32xf32>
    %c0_4 = arith.constant 0 : index
    %c0_5 = arith.constant 0 : index
    %5 = vector.load %arg2[%c0_4, %c0_5] : memref<8x32xf32, #tpu.memory_space<vmem>>, vector<8x32xf32>
    %6 = vector.shape_cast %5 : vector<8x32xf32> to vector<8x1x32xf32>
    %7 = vector.broadcast %6 : vector<8x1x32xf32> to vector<8x8x32xf32>
    %8 = arith.addf %4, %7 : vector<8x8x32xf32>
    %9 = math.tanh %8 : vector<8x8x32xf32>
    %c0_6 = arith.constant 0 : index
    %c0_7 = arith.constant 0 : index
    %10 = vector.load %arg5[%c0_6, %c0_7] : memref<1x32xf32, #tpu.memory_space<vmem>>, vector<1x32xf32>
    %11 = vector.shape_cast %10 : vector<1x32xf32> to vector<1x1x32xf32>
    %12 = vector.broadcast %11 : vector<1x1x32xf32> to vector<8x8x32xf32>
    %13 = arith.mulf %9, %12 : vector<8x8x32xf32>
    %cst_8 = arith.constant dense<0.000000e+00> : vector<8x8xf32>
    %14 = vector.multi_reduction <add>, %13, %cst_8 [2] : vector<8x8x32xf32> to vector<8x8xf32>
    %c0_9 = arith.constant 0 : index
    %c0_10 = arith.constant 0 : index
    %15 = vector.load %arg3[%c0_9, %c0_10] : memref<8x8xbf16, #tpu.memory_space<vmem>>, vector<8x8xbf16>
    %16 = arith.extf %15 : vector<8x8xbf16> to vector<8x8xf32>
    %17 = arith.addf %14, %16 : vector<8x8xf32>
    %cst_11 = arith.constant dense<0xFF800000> : vector<8xf32>
    %18 = vector.multi_reduction <maximumf>, %17, %cst_11 [1] : vector<8x8xf32> to vector<8xf32>
    %19 = vector.shape_cast %18 : vector<8xf32> to vector<8x1xf32>
    %20 = vector.broadcast %19 : vector<8x1xf32> to vector<8x8xf32>
    %21 = arith.subf %17, %20 : vector<8x8xf32>
    %22 = math.exp %21 : vector<8x8xf32>
    %cst_12 = arith.constant dense<0.000000e+00> : vector<8xf32>
    %23 = vector.multi_reduction <add>, %22, %cst_12 [1] : vector<8x8xf32> to vector<8xf32>
    %24 = vector.shape_cast %23 : vector<8xf32> to vector<8x1xf32>
    %25 = arith.truncf %22 : vector<8x8xf32> to vector<8x8xbf16>
    %26 = vector.shape_cast %25 : vector<8x8xbf16> to vector<8x1x8xbf16>
    "tpu.trace_start"() <{level = 10 : i32, message = "bqs,bsh->bqh"}> : () -> ()
    %cst_13 = arith.constant dense<0.000000e+00> : vector<8x1x32xf32>
    %27 = tpu.matmul %26, %0, %cst_13 {dimension_numbers = #tpu.dot_dimension_numbers<[2], [1], [1], [2], [0, 0, 0, 1, 1, 2], [0], [0]>} : vector<8x1x8xbf16>, vector<8x8x32xbf16>, vector<8x1x32xf32> -> vector<8x1x32xf32>
    "tpu.trace_stop"() : () -> ()
    %28 = vector.shape_cast %27 : vector<8x1x32xf32> to vector<8x32xf32>
    %29 = vector.broadcast %24 : vector<8x1xf32> to vector<8x32xf32>
    %30 = arith.divf %28, %29 : vector<8x32xf32>
    %c0_14 = arith.constant 0 : index
    %c0_15 = arith.constant 0 : index
    %31 = vector.load %arg6[%c0_14, %c0_15] : memref<8x32xf32, #tpu.memory_space<vmem>>, vector<8x32xf32>
    tpu.vector_store %arg6[%c0_14, %c0_15], %30 {strides = array<i32>} : memref<8x32xf32, #tpu.memory_space<vmem>>, vector<8x32xf32>,
    return
  }
  func.func @transform_0(%arg0: i32) -> (i32, i32, i32) {
    %c0_i32 = arith.constant 0 : i32
    %c0_i32_0 = arith.constant 0 : i32
    %c0_i32_1 = arith.constant 0 : i32
    return %arg0, %c0_i32, %c0_i32_0 : i32, i32, i32
  }
  func.func @transform_1(%arg0: i32) -> (i32, i32) {
    %c0_i32 = arith.constant 0 : i32
    %c0_i32_0 = arith.constant 0 : i32
    return %arg0, %c0_i32 : i32, i32
  }
  func.func @transform_2(%arg0: i32) -> (i32, i32) {
    %c0_i32 = arith.constant 0 : i32
    %c0_i32_0 = arith.constant 0 : i32
    return %arg0, %c0_i32 : i32, i32
  }
  func.func @transform_3(%arg0: i32) -> (i32, i32) {
    %c0_i32 = arith.constant 0 : i32
    %c0_i32_0 = arith.constant 0 : i32
    %c0_i32_1 = arith.constant 0 : i32
    return %c0_i32, %c0_i32_0 : i32, i32
  }
  func.func @transform_4(%arg0: i32) -> (i32, i32) {
    %c0_i32 = arith.constant 0 : i32
    %c0_i32_0 = arith.constant 0 : i32
    %c0_i32_1 = arith.constant 0 : i32
    return %c0_i32, %c0_i32_0 : i32, i32
  }
  func.func @transform_5(%arg0: i32) -> (i32, i32) {
    %c0_i32 = arith.constant 0 : i32
    %c0_i32_0 = arith.constant 0 : i32
    return %arg0, %c0_i32 : i32, i32
  }
}

</mosaic_0001>

<bundles_post_ra>
// kernel: tpu_custom_call.1
= control target key start
LH: loop header
LB: loop body
LE: loop exit
PB: predicated region body
PF: predicated region fallthrough
CT: control target
= control target key end

     0   :  { %10 = vsyncpa [#allocation3], 0  ;;  %s1729_s0 = inlined_call_operand.hbm [shape: bf16[8,8,32], index: 0, kind: input, shape index: {}]   ;;  %s1730_s1 = inlined_call_operand.hbm [shape: f32[8,32], index: 1, kind: input, shape index: {}]   ;;  %s1731_s2 = inlined_call_operand.hbm [shape: bf16[8,8], index: 2, kind: input, shape index: {}]   ;;  %s1732_s3 = inlined_call_operand.hbm [shape: bf16[32,32], index: 3, kind: input, shape index: {}]   ;;  %s1733_s4 = inlined_call_operand.vmem [shape: f32[1,32], index: 4, kind: input, shape index: {}]   ;;  %s1734_s5 = inlined_call_operand.hbm [shape: f32[8,32], index: 5, kind: output, shape index: {}]  }
   0x1   :  { %11 = vsyncpa [#allocation6], 0 }
   0x2   :  { %12 = vsyncpa [#allocation9], 0 }
   0x3   :  { %13 = vsyncpa [#allocation4], 0  ;;  %s1448_s18 = smov [#allocation5]   ;;  %s1449_s20 = smov [#allocation2]  }
   0x4   :  { %s32_s19 = sshll.u32 %s1448_s18, 4  ;;  %s19_s21 = sshll.u32 %s1449_s20, 4  ;;  %s33_s19 = int_to_ptr.vmem [resolvable:$true] %s32_s19  ;;  %s20_s21 = int_to_ptr.vmem [resolvable:$true] %s19_s21 }
   0x5   :  { %s1348_s22 = scalar_lea.vmem %s33_s19, 128  ;;  %p1353_p1 = scmp.lt.s32.totalorder %s33_s19, %s33_s19 }
   0x6   :  { %p1349_p0 = scmp.ne.s32.totalorder %s33_s19, %s1348_s22  ;;  %p1354_p2 = scmp.lt.s32.totalorder %s1348_s22, %s1348_s22 }
   0x8   :  { %p1355_p3 = por %p1354_p2, %p1353_p1 }
   0xa   :  { %p1356_p4 = pnand %p1355_p3, %p1349_p0 }
   0xc   :  { %1359 = shalt.err (!%p1356_p4)
}
   0xd   :  { %35 = dma.hbm_to_vmem [thread:$0]  %s1730_s1, 128, %s33_s19, [#allocation6]  }
   0xe   :  { %s1368_s25 = scalar_lea.vmem %s20_s21, 512  ;;  %p1373_p6 = scmp.lt.s32.totalorder %s20_s21, %s20_s21 }
   0xf   :  { %p1369_p5 = scmp.ne.s32.totalorder %s20_s21, %s1368_s25  ;;  %p1374_p7 = scmp.lt.s32.totalorder %s1368_s25, %s1368_s25 }
  0x11   :  { %p1375_p8 = por %p1374_p7, %p1373_p6 }
  0x13   :  { %p1376_p9 = pnand %p1375_p8, %p1369_p5 }
  0x15   :  { %1379 = shalt.err (!%p1376_p9)
}
  0x16   :  { %s1450_s26 = smov 64   ;;  %s1451_s27 = smov 4  }
  0x17   :  { %25 = dma.hbm_to_vmem [thread:$0]  %s1729_s0, 512, %s20_s21, [#allocation3], %s1450_s26, %s1450_s26, %s1451_s27  }
  0x18   :  { %s1452_s30 = smov [#allocation7]   ;;  %s1453_s7 = smov [#allocation8]  }
  0x19   :  { %s42_s6 = sshll.u32 %s1452_s30, 4  ;;  %s51_s8 = sshll.u32 %s1453_s7, 4  ;;  %s43_s6 = int_to_ptr.vmem [resolvable:$true] %s42_s6  ;;  %s52_s8 = int_to_ptr.vmem [resolvable:$true] %s51_s8 }
  0x1a   :  { %s1388_s1 = scalar_lea.vmem %s43_s6, 64  ;;  %p1393_p11 = scmp.lt.s32.totalorder %s43_s6, %s43_s6 }
  0x1b   :  { %p1389_p10 = scmp.ne.s32.totalorder %s43_s6, %s1388_s1  ;;  %p1394_p12 = scmp.lt.s32.totalorder %s1388_s1, %s1388_s1 }
  0x1d   :  { %p1395_p13 = por %p1394_p12, %p1393_p11 }
  0x1f   :  { %p1396_p0 = pnand %p1395_p13, %p1389_p10 }
  0x21   :  { %1399 = shalt.err (!%p1396_p0)
}
  0x22   :  { %45 = dma.hbm_to_vmem [thread:$0]  %s1731_s2, 64, %s43_s6, [#allocation6]  }
  0x23   :  { %s1408_s11 = scalar_lea.vmem %s52_s8, 256  ;;  %p1413_p2 = scmp.lt.s32.totalorder %s52_s8, %s52_s8 }
  0x24   :  { %p1409_p1 = scmp.ne.s32.totalorder %s52_s8, %s1408_s11  ;;  %p1414_p3 = scmp.lt.s32.totalorder %s1408_s11, %s1408_s11 }
  0x26   :  { %p1415_p4 = por %p1414_p3, %p1413_p2 }
  0x28   :  { %p1416_p5 = pnand %p1415_p4, %p1409_p1 }
  0x2a   :  { %1419 = shalt.err (!%p1416_p5)
}
  0x2b   :  { %57 = dma.hbm_to_vmem [thread:$0]  %s1732_s3, 256, %s52_s8, [#allocation9], %s1450_s26, %s1450_s26, %s1451_s27  }
  0x2c   :  { %1440 = dma.done.wait [#allocation3], 512  }
  0x2d   :  { %1441 = vsyncadd [#allocation3], 4294966784 }
  0x2e   :  { %1442 = dma.done.wait [#allocation6], 192  }
  0x2f   :  { %1443 = vsyncadd [#allocation6], 4294967104 }
  0x30   :  { %1444 = dma.done.wait [#allocation9], 256  }
  0x31   :  { %1445 = vsyncadd [#allocation9], 4294967040  ;;  %v201_v0 = vlaneseq  ;;  %v1285_v2 = vld [vmem:[#allocation8 + $0x8] sm:$0xff]   ;;  %v1286_v3 = vld [vmem:[#allocation8] sm:$0xff]   ;;  %vm117_vm0 = vcmask 261120   ;;  %vm482_vm1 = vcmask 1041409  }
  0x32   :  { %1212 = vmatprep.subr.bf16.mxu0 %v1285_v2  ;;  %v1504_v4 = vld [vmem:[#allocation2] sm:$0xf]  ;;  %v1506_v5 = vld [vmem:[#allocation2 + $0x4] sm:$0xf]  ;;  %v1510_v7 = vld [vmem:[#allocation2 + $0x8] sm:$0xf] }
  0x33   :  { %v1502_v1 = vshrl.u32 %v201_v0, 7  ;;  %1213 = vmatpush3.bf16.msra.mxu0 %v1285_v2  ;;  %v1171_v6 = vcombine.low %v1504_v4, %v1506_v5  ;;  %v1512_v8 = vld [vmem:[#allocation2 + $0xc] sm:$0xf]  ;;  %v1518_v11 = vld [vmem:[#allocation2 + $0x10] sm:$0xf]  ;;  %v195_v34 = vld [vmem:[#allocation5] sm:$0xff] }
  0x34   :  { %1214 = vmatprep.subr.bf16.mxu0 %v1286_v3  ;;  %v1520_v12 = vld [vmem:[#allocation2 + $0x14] sm:$0xf]  ;;  %v341_v13 = vld [vmem:[#allocation7] sm:$0xf]  ;;  %v1172_v16 = vcombine.low %v1510_v7, %v1512_v8  ;;  %v1545_v24 = vld [vmem:[#allocation2 + $0x18] sm:$0xf]  ;;  %v197_v38 = vcombine.high %v195_v34, %v195_v34 }
  0x35   :  { %v353_v9 = vsub.s32 1, %v1502_v1  ;;  %v1516_v10 = vsub.s32 0, %v1502_v1  ;;  %1216 = vmatprep.mubr.msk.bf16.mxu0 %vm117_vm0, %v1171_v6  ;;  %v1523_v14 = vunpack.c.l.bf16 %v341_v13  ;;  %v360_v15 = vsub.s32 2, %v1502_v1  ;;  %v1547_v25 = vld [vmem:[#allocation2 + $0x1c] sm:$0xf] }
  0x36   :  { %v374_v17 = vsub.s32 4, %v1502_v1  ;;  %v1173_v18 = vcombine.low %v1518_v11, %v1520_v12  ;;  %v367_v22 = vsub.s32 3, %v1502_v1  ;;  %v381_v27 = vsub.s32 5, %v1502_v1 }
  0x37   :  { %1215 = vmatpush3.bf16.msra.mxu0 %v1286_v3  ;;  %v354_v19 = vrot.slane %v1523_v14, %v353_v9  ;;  %v347_v20 = vrot.slane %v1523_v14, %v1516_v10  ;;  %v361_v21 = vrot.slane %v1523_v14, %v360_v15  ;;  %v1174_v28 = vcombine.low %v1545_v24, %v1547_v25 }
  0x38   :  { %v375_v23 = vrot.slane %v1523_v14, %v374_v17  ;;  %v368_v26 = vrot.slane %v1523_v14, %v367_v22  ;;  %v382_v29 = vrot.slane %v1523_v14, %v381_v27  ;;  %v1454_v30 = vmov 1966171168  }
  0x39   :  { %356 = vbcast.lane.b32.xlu1 %v354_v19, 256  ;;  %349 = vbcast.lane.b32.xlu0 %v347_v20, 256  ;;  %v199_v31 = vunpack.c.l.s4 %v1454_v30  ;;  %v1181_v20 = vld [vmem:[%s1733_s4] ss:$0 sm:$0xff]  ;;  %vm484_vm2 = vcmask 1042434   ;;  %vm486_vm3 = vcmask 1043459  }
  0x3a   :  { %1217 = vmatmul.mubr.msk.bf16.vlgmr.msra.gmra.mxu0 %vm117_vm0, %v1172_v16  ;;  %vm488_vm4 = vcmask 1044484   ;;  %vm490_vm5 = vcmask 1045509   ;;  %vm492_vm6 = vcmask 1046534   ;;  %vm494_vm7 = vcmask 1047559   ;;  %s1458_s4 = smov [#allocation10]  }
  0x3b   :  { %1220 = vmatprep.mubr.msk.bf16.mxu0 %vm117_vm0, %v1173_v18  ;;  %v200_v32 = vunpack.c.0.s8 %v199_v31  ;;  %vm497_vm8 = vcmask 64512   ;;  %vm662_vm9 = vcmask 1043456   ;;  %vm1457_vm10 = vmmov 0   ;;  %s1160_s13 = sshll.u32 %s1458_s4, 4  ;;  %s1161_s13 = int_to_ptr.vmem [resolvable:$true] %s1160_s13 }
  0x3c   :  { %s1420_s14 = scalar_lea.vmem %s1161_s13, 128  ;;  %p1425_p7 = scmp.lt.s32.totalorder %s1161_s13, %s1161_s13 }
  0x3d   :  { %363 = vbcast.lane.b32.xlu1 %v361_v21, 256  ;;  %377 = vbcast.lane.b32.xlu0 %v375_v23, 256  ;;  %v203_v33 = vsub.s32 %v200_v32, %v1502_v1  ;;  %p1421_p6 = scmp.ne.s32.totalorder %s1161_s13, %s1420_s14  ;;  %p1426_p8 = scmp.lt.s32.totalorder %s1420_s14, %s1420_s14 }
  0x3f   :  { %v204_v35 = vrot.slane %v195_v34, %v203_v33  ;;  %v211_v41 = vrot.slane %v197_v38, %v203_v33  ;;  %p1427_p9 = por %p1426_p8, %p1425_p7 }
  0x41   :  { %370 = vbcast.lane.b32.xlu1 %v368_v26, 256  ;;  %v220_v36 = vrot.slane %v204_v35, %v203_v33  ;;  %v212_v37 = vcombine.high %v204_v35, %v204_v35  ;;  %v227_v44 = vrot.slane %v211_v41, %v203_v33  ;;  %v213_v45 = vcombine.high %v211_v41, %v211_v41  ;;  %p1428_p10 = pnand %p1427_p9, %p1421_p6 }
  0x42   :  { %1221 = vmatmul.mubr.msk.bf16.gmra.mxu0 %vm117_vm0, %v1174_v28 }
  0x43   :  { %v242_v39 = vcombine.high %v220_v36, %v220_v36  ;;  %v234_v40 = vrot.slane %v212_v37, %v203_v33  ;;  %v249_v46 = vrot.slane %v220_v36, %v1516_v10  ;;  %v243_v50 = vcombine.high %v227_v44, %v227_v44 }
  0x44   :  { %v241_v51 = vrot.slane %v213_v45, %v203_v33  ;;  %v265_v61 = vrot.slane %v227_v44, %v1516_v10 }
  0x45   :  { %384 = vbcast.lane.b32.xlu1 %v382_v29, 256  ;;  %v257_v42 = vrot.slane %v242_v39, %v1516_v10  ;;  %v244_v43 = vcombine.high %v234_v40, %v234_v40  ;;  %v253_v54 = vrot.slane %v234_v40, %v1516_v10  ;;  %v273_v57 = vrot.slane %v243_v50, %v1516_v10 }
  0x46   :  { %v245_v58 = vcombine.high %v241_v51, %v241_v51  ;;  %v269_v13 = vrot.slane %v241_v51, %v1516_v10  ;;  %v395_v51 = vsub.s32 7, %v1502_v1 }
  0x47   :  { %v261_v49 = vrot.slane %v244_v43, %v1516_v10 }
  0x48   :  { %v277_v2 = vrot.slane %v245_v58, %v1516_v10 }
  0xab   :  { %v350_v58 = vpop.permute.xlu0 %349 }
  0xfa   :  { %v1218_v47 = vpop.f32.mrf.mxu0 }
  0xfb   :  { %v288_v48 = vadd.f32 %v1218_v47, %v257_v42 }
  0xfc   :  { %v164_v52 = vpop.f32.mrf.mxu0 }
  0xfd   :  { %1292 = vtanh.f32 %v288_v48  ;;  %v286_v53 = vadd.f32 %v249_v46, %v164_v52  ;;  %v1455_v48 = vmov 0   ;;  %v388_v52 = vsub.s32 6, %v1502_v1 }
  0xfe   :  { %v1219_v55 = vpop.f32.mrf.mxu0  ;;  %1283 = vset.pattern.permute.xlu1 %v1455_v48  ;;  %1284 = vset.pattern.permute.xlu0 %v1455_v48 }
  0xff   :  { %1294 = vtanh.f32 %v286_v53  ;;  %v289_v56 = vadd.f32 %v1219_v55, %v261_v49  ;;  %v396_v53 = vrot.slane %v1523_v14, %v395_v51  ;;  %v357_v55 = vpop.permute.xlu1 %356 }
 0x100   :  { %v167_v59 = vpop.f32.mrf.mxu0 }
 0x101   :  { %1296 = vtanh.f32 %v289_v56  ;;  %v287_v60 = vadd.f32 %v253_v54, %v167_v59  ;;  %v389_v54 = vrot.slane %v1523_v14, %v388_v52 }
 0x102   :  { %v1222_v62 = vpop.f32.mrf.mxu0 }
 0x103   :  { %1298 = vtanh.f32 %v287_v60  ;;  %v292_v63 = vadd.f32 %v1222_v62, %v273_v57  ;;  %v364_v56 = vpop.permute.xlu1 %363  ;;  %v378_v60 = vpop.permute.xlu0 %377 }
 0x104   :  { %v180_v3 = vpop.f32.mrf.mxu0 }
 0x105   :  { %1300 = vtanh.f32 %v292_v63  ;;  %v290_v6 = vadd.f32 %v265_v61, %v180_v3 }
 0x106   :  { %v1223_v16 = vpop.f32.mrf.mxu0 }
 0x107   :  { %1302 = vtanh.f32 %v290_v6  ;;  %v293_v18 = vadd.f32 %v1223_v16, %v277_v2  ;;  %v371_v57 = vpop.permute.xlu1 %370 }
 0x108   :  { %v183_v19 = vpop.f32.mrf.mxu0 }
 0x109   :  { %1304 = vtanh.f32 %v293_v18  ;;  %v291_v21 = vadd.f32 %v269_v13, %v183_v19 }
 0x10a   :  { %v1293_v23 = vpop.eup %1292 }
 0x10b   :  { %1306 = vtanh.f32 %v291_v21  ;;  %v311_v26 = vmul.f32 %v1293_v23, %v1181_v20  ;;  %v385_v59 = vpop.permute.xlu1 %384 }
 0x10c   :  { %v1295_v28 = vpop.eup %1294 }
 0x10d   :  { %v323_v29 = vsel %vm117_vm0, %v311_v26, 0.0  ;;  %v309_v30 = vmul.f32 %v1295_v28, %v1181_v20 }
 0x10e   :  { %v1297_v31 = vpop.eup %1296  ;;  %324 = vadd.xlane.f32.xlu1 %v323_v29 }
 0x10f   :  { %v317_v32 = vsel %vm117_vm0, %v309_v30, 0.0  ;;  %v312_v33 = vmul.f32 %v1297_v31, %v1181_v20  ;;  %v449_v31 = vand.u32 127, %v201_v0 }
 0x110   :  { %v1299_v34 = vpop.eup %1298  ;;  %318 = vadd.xlane.f32.xlu0 %v317_v32 }
 0x111   :  { %v326_v35 = vsel %vm117_vm0, %v312_v33, 0.0  ;;  %v310_v36 = vmul.f32 %v1299_v34, %v1181_v20  ;;  %v1607_v33 = vsub.s32 %v449_v31, %v1502_v1 }
 0x112   :  { %v1301_v37 = vpop.eup %1300  ;;  %327 = vadd.xlane.f32.xlu1 %v326_v35 }
 0x113   :  { %v320_v38 = vsel %vm117_vm0, %v310_v36, 0.0  ;;  %v315_v39 = vmul.f32 %v1301_v37, %v1181_v20 }
 0x114   :  { %v1303_v40 = vpop.eup %1302  ;;  %321 = vadd.xlane.f32.xlu0 %v320_v38 }
 0x115   :  { %v335_v42 = vsel %vm117_vm0, %v315_v39, 0.0  ;;  %v313_v44 = vmul.f32 %v1303_v40, %v1181_v20 }
 0x116   :  { %v1305_v41 = vpop.eup %1304 }
 0x117   :  { %v316_v43 = vmul.f32 %v1305_v41, %v1181_v20  ;;  %v329_v49 = vsel %vm117_vm0, %v313_v44, 0.0 }
 0x118   :  { %v1307_v45 = vpop.eup %1306  ;;  %336 = vadd.xlane.f32.xlu0 %v335_v42 }
 0x119   :  { %v338_v46 = vsel %vm117_vm0, %v316_v43, 0.0  ;;  %v314_v47 = vmul.f32 %v1307_v45, %v1181_v20 }
 0x11a   :  { %339 = vadd.xlane.f32.xlu1 %v338_v46 }
 0x11b   :  { %v332_v50 = vsel %vm117_vm0, %v314_v47, 0.0 }
 0x11c   :  { %330 = vadd.xlane.f32.xlu0 %v329_v49 }
 0x11e   :  { %333 = vadd.xlane.f32.xlu1 %v332_v50 }
 0x12f   :  { %398 = vbcast.lane.b32.xlu1 %v396_v53, 256 }
 0x132   :  { %391 = vbcast.lane.b32.xlu0 %v389_v54, 256 }
 0x197   :  { %v325_v61 = vpop.xlane.xlu1 %324 }
 0x198   :  { %v1587_v62 = vadd.f32 %v364_v56, %v325_v61 }
 0x199   :  { %v319_v63 = vpop.xlane.xlu0 %318 }
 0x19a   :  { %v1589_v2 = vadd.f32 %v350_v58, %v319_v63  ;;  %431 = vperm.xlu1 %1283, %v1587_v62  }
 0x19b   :  { %v328_v3 = vpop.xlane.xlu1 %327 }
 0x19c   :  { %425 = vperm.xlu0 %1284, %v1589_v2   ;;  %v1593_v6 = vadd.f32 %v371_v57, %v328_v3 }
 0x19d   :  { %v322_v14 = vpop.xlane.xlu0 %321 }
 0x19e   :  { %v409_v13 = vadd.f32 %v357_v55, %v322_v14 }
 0x1a0   :  { %434 = vperm.xlu0 %1284, %v1593_v6   ;;  %428 = vperm.xlu1 %1283, %v409_v13  }
 0x1a1   :  { %v337_v16 = vpop.xlane.xlu0 %336 }
 0x1a3   :  { %v340_v18 = vpop.xlane.xlu1 %339 }
 0x1a5   :  { %v331_v19 = vpop.xlane.xlu0 %330 }
 0x1a6   :  { %v1596_v20 = vadd.f32 %v378_v60, %v331_v19 }
 0x1a7   :  { %v334_v21 = vpop.xlane.xlu1 %333 }
 0x1a8   :  { %v1598_v23 = vadd.f32 %v385_v59, %v334_v21  ;;  %437 = vperm.xlu1 %1283, %v1596_v20  }
 0x1a9   :  { %v392_v26 = vpop.permute.xlu0 %391 }
 0x1aa   :  { %v1601_v28 = vadd.f32 %v392_v26, %v337_v16  ;;  %440 = vperm.xlu0 %1284, %v1598_v23  }
 0x1ab   :  { %v399_v29 = vpop.permute.xlu1 %398 }
 0x1ac   :  { %v415_v30 = vadd.f32 %v399_v29, %v340_v18  ;;  %443 = vperm.xlu1 %1283, %v1601_v28  }
 0x1ae   :  { %446 = vperm.xlu0 %1284, %v415_v30  }
 0x215   :  { %v432_v32 = vpop.permute.xlu1 %431 }
 0x216   :  { %v461_v39 = vrot.slane %v432_v32, %v1607_v33 }
 0x217   :  { %v426_v34 = vpop.permute.xlu0 %425 }
 0x218   :  { %v453_v37 = vrot.slane %v426_v34, %v1607_v33 }
 0x21b   :  { %v429_v35 = vpop.permute.xlu1 %428  ;;  %v435_v40 = vpop.permute.xlu0 %434 }
 0x21c   :  { %v457_v36 = vrot.slane %v429_v35, %v1607_v33  ;;  %v465_v0 = vrot.slane %v435_v40, %v1607_v33 }
 0x21e   :  { %v483_v38 = vsel %vm482_vm1, %v457_v36, %v453_v37  ;;  %v664_v36 = vsel %vm662_vm9, %v1504_v4, 0 }
 0x21f   :  { %v485_v41 = vsel %vm484_vm2, %v461_v39, %v483_v38  ;;  %v832_v38 = vsel %vm662_vm9, %v1512_v8, 0 }
 0x220   :  { %v487_v44 = vsel %vm486_vm3, %v465_v0, %v485_v41 }
 0x223   :  { %v438_v42 = vpop.permute.xlu1 %437 }
 0x224   :  { %v469_v43 = vrot.slane %v438_v42, %v1607_v33 }
 0x225   :  { %v441_v45 = vpop.permute.xlu0 %440 }
 0x226   :  { %v489_v46 = vsel %vm488_vm4, %v469_v43, %v487_v44  ;;  %v473_v47 = vrot.slane %v441_v45, %v1607_v33 }
 0x227   :  { %v444_v48 = vpop.permute.xlu1 %443 }
 0x228   :  { %v491_v49 = vsel %vm490_vm5, %v473_v47, %v489_v46  ;;  %v477_v50 = vrot.slane %v444_v48, %v1607_v33 }
 0x229   :  { %v447_v53 = vpop.permute.xlu0 %446 }
 0x22a   :  { %v481_v54 = vrot.slane %v447_v53, %v1607_v33  ;;  %v493_v55 = vsel %vm492_vm6, %v477_v50, %v491_v49 }
 0x22c   :  { %v495_v56 = vsel %vm494_vm7, %v481_v54, %v493_v55 }
 0x22d   :  { %v498_v57 = vsel %vm497_vm8, %v495_v56, -inf  ;;  %v720_v56 = vsel %vm662_vm9, %v1506_v5, 0 }
 0x22e   :  { %499 = vmax.xlane.f32.xlu1 %v498_v57 }
 0x2b7   :  { %v500_v58 = vpop.xlane.xlu1 %499 }
 0x2b8   :  { %v505_v59 = vrot.slane %v500_v58, %v1516_v10  ;;  %v509_v60 = vrot.slane %v500_v58, %v353_v9  ;;  %v513_v61 = vrot.slane %v500_v58, %v360_v15  ;;  %v533_v63 = vrot.slane %v500_v58, %v395_v51 }
 0x2b9   :  { %v517_v18 = vrot.slane %v500_v58, %v367_v22  ;;  %v521_v9 = vrot.slane %v500_v58, %v374_v17  ;;  %v1456_v17 = vmov 0.0  }
 0x2ba   :  { %v543_v3 = vsub.f32 %v409_v13, %v509_v60  ;;  %v542_v14 = vsub.f32 %v1589_v2, %v505_v59  ;;  %v549_v16 = vsub.f32 %v415_v30, %v533_v63  ;;  %v544_v10 = vsub.f32 %v1587_v62, %v513_v61  ;;  %1224 = vmatprep.subr.bf16.mxu1 %v1456_v17 }
 0x2bb   :  { %v545_v51 = vsub.f32 %v1593_v6, %v517_v18  ;;  %v525_v2 = vrot.slane %v500_v58, %v381_v27  ;;  %v546_v22 = vsub.f32 %v1596_v20, %v521_v9  ;;  %v529_v62 = vrot.slane %v500_v58, %v388_v52  ;;  %1242 = vmatprep.subr.bf16.mxu0 %v1456_v17 }
 0x2bc   :  { %v552_v19 = vmul.f32 1.442695, %v543_v3  ;;  %v550_v21 = vmul.f32 1.442695, %v542_v14  ;;  %v564_v26 = vmul.f32 1.442695, %v549_v16  ;;  %1226 = vmatprep.mubr.msk.bf16.mxu1 %vm1457_vm10, %v1456_v17  ;;  %1244 = vmatprep.mubr.msk.bf16.mxu0 %vm1457_vm10, %v1456_v17 }
 0x2bd   :  { %v554_v15 = vmul.f32 1.442695, %v544_v10  ;;  %v556_v13 = vmul.f32 1.442695, %v545_v51  ;;  %v547_v29 = vsub.f32 %v1598_v23, %v525_v2  ;;  %v558_v30 = vmul.f32 1.442695, %v546_v22  ;;  %1225 = vmatpush3.bf16.msra.mxu1 %v664_v36  ;;  %1243 = vmatpush3.bf16.msra.mxu0 %v832_v38 }
 0x2be   :  { %1308 = vpow2.f32 %v552_v19  ;;  %v548_v27 = vsub.f32 %v1601_v28, %v529_v62  ;;  %1230 = vmatprep.subr.bf16.mxu1 %v1456_v17  ;;  %1254 = vmatprep.subr.bf16.mxu0 %v1456_v17  ;;  %v776_v61 = vsel %vm662_vm9, %v1510_v7, 0  ;;  %v944_v16 = vsel %vm662_vm9, %v1520_v12, 0 }
 0x2bf   :  { %1310 = vpow2.f32 %v550_v21  ;;  %v560_v31 = vmul.f32 1.442695, %v547_v29  ;;  %v888_v19 = vsel %vm662_vm9, %v1518_v11, 0  ;;  %v1056_v9 = vsel %vm662_vm9, %v1547_v25, 0 }
 0x2c0   :  { %1312 = vpow2.f32 %v564_v26  ;;  %v562_v1 = vmul.f32 1.442695, %v548_v27  ;;  %v1000_v51 = vsel %vm662_vm9, %v1545_v24, 0 }
 0x2c1   :  { %1314 = vpow2.f32 %v554_v15 }
 0x2c2   :  { %1316 = vpow2.f32 %v556_v13 }
 0x2c3   :  { %1318 = vpow2.f32 %v558_v30 }
 0x2c4   :  { %1320 = vpow2.f32 %v560_v31 }
 0x2c5   :  { %1322 = vpow2.f32 %v562_v1 }
 0x2cb   :  { %v1309_v6 = vpop.eup %1308 }
 0x2cc   :  { %578 = vperm.xlu1 %1283, %v1309_v6   ;;  %v1311_v32 = vpop.eup %1310  ;;  %v642_v23 = vpack.c.bf16 %v1309_v6, %v1309_v6 }
 0x2cd   :  { %v641_v20 = vpack.c.bf16 %v1311_v32, %v1311_v32  ;;  %v1313_v34 = vpop.eup %1312 }
 0x2ce   :  { %v1315_v35 = vpop.eup %1314  ;;  %v707_v28 = vunpack.c.l.b16 %v642_v23  ;;  %v648_v49 = vpack.c.bf16 %v1313_v34, %v1313_v34 }
 0x2cf   :  { %v650_v52 = vunpack.c.l.b16 %v641_v20  ;;  %v643_v37 = vpack.c.bf16 %v1315_v35, %v1315_v35  ;;  %v1317_v39 = vpop.eup %1316 }
 0x2d0   :  { %596 = vperm.xlu1 %1283, %v1313_v34   ;;  %v644_v40 = vpack.c.bf16 %v1317_v39, %v1317_v39  ;;  %v1319_v41 = vpop.eup %1318  ;;  %v1043_v50 = vunpack.c.l.b16 %v648_v49 }
 0x2d1   :  { %652 = vperm.xlu0 %1284, %v650_v52   ;;  %v763_v4 = vunpack.c.l.b16 %v643_v37  ;;  %v1321_v0 = vpop.eup %1320  ;;  %v645_v43 = vpack.c.bf16 %v1319_v41, %v1319_v41 }
 0x2d2   :  { %v819_v42 = vunpack.c.l.b16 %v644_v40  ;;  %v646_v45 = vpack.c.bf16 %v1321_v0, %v1321_v0  ;;  %v1323_v46 = vpop.eup %1322 }
 0x2d3   :  { %v875_v44 = vunpack.c.l.b16 %v645_v43  ;;  %v647_v48 = vpack.c.bf16 %v1323_v46, %v1323_v46 }
 0x2d4   :  { %v931_v47 = vunpack.c.l.b16 %v646_v45 }
 0x2d5   :  { %709 = vperm.xlu0 %1284, %v707_v28   ;;  %v987_v8 = vunpack.c.l.b16 %v647_v48 }
 0x2d9   :  { %765 = vperm.xlu0 %1284, %v763_v4  }
 0x2dd   :  { %821 = vperm.xlu0 %1284, %v819_v42  }
 0x2e1   :  { %877 = vperm.xlu0 %1284, %v875_v44  }
 0x2e5   :  { %933 = vperm.xlu0 %1284, %v931_v47  }
 0x2e9   :  { %989 = vperm.xlu0 %1284, %v987_v8  }
 0x2ed   :  { %1045 = vperm.xlu0 %1284, %v1043_v50  }
 0x2f1   :  { %575 = vperm.xlu0 %1284, %v1311_v32  }
 0x2f5   :  { %581 = vperm.xlu0 %1284, %v1315_v35  }
 0x2f9   :  { %584 = vperm.xlu0 %1284, %v1317_v39  }
 0x2fd   :  { %587 = vperm.xlu0 %1284, %v1319_v41  }
 0x301   :  { %590 = vperm.xlu0 %1284, %v1321_v0  }
 0x305   :  { %593 = vperm.xlu0 %1284, %v1323_v46  }
 0x347   :  { %v579_v31 = vpop.permute.xlu1 %578 }
 0x348   :  { %v605_v20 = vrot.slane %v579_v31, %v1607_v33 }
 0x34b   :  { %v597_v35 = vpop.permute.xlu1 %596 }
 0x34c   :  { %v653_v53 = vpop.permute.xlu0 %652  ;;  %v629_v4 = vrot.slane %v597_v35, %v1607_v33 }
 0x34d   :  { %v657_v54 = vrot.slane %v653_v53, %v1607_v33 }
 0x34f   :  { %v658_v55 = vpack.c.b16 %v657_v54, %v657_v54 }
 0x350   :  { %v710_v57 = vpop.permute.xlu0 %709 }
 0x351   :  { %1227 = vmatmul.mubr.msk.bf16.vlgmr.msra.gmra.mxu1 %vm497_vm8, %v658_v55  ;;  %v714_v58 = vrot.slane %v710_v57, %v1607_v33 }
 0x352   :  { %1231 = vmatpush3.bf16.msra.mxu1 %v720_v56  ;;  %1232 = vmatprep.mubr.msk.bf16.mxu1 %vm1457_vm10, %v1456_v17 }
 0x353   :  { %1236 = vmatprep.subr.bf16.mxu1 %v1456_v17  ;;  %v715_v60 = vpack.c.b16 %v714_v58, %v714_v58 }
 0x354   :  { %v766_v59 = vpop.permute.xlu0 %765 }
 0x355   :  { %v770_v5 = vrot.slane %v766_v59, %v1607_v33 }
 0x357   :  { %v771_v7 = vpack.c.b16 %v770_v5, %v770_v5 }
 0x358   :  { %v822_v63 = vpop.permute.xlu0 %821 }
 0x359   :  { %v826_v3 = vrot.slane %v822_v63, %v1607_v33  ;;  %1233 = vmatmul.mubr.msk.bf16.vlgmr.msra.gmra.mxu1 %vm497_vm8, %v715_v60 }
 0x35a   :  { %1237 = vmatpush3.bf16.msra.mxu1 %v776_v61  ;;  %1238 = vmatprep.mubr.msk.bf16.mxu1 %vm1457_vm10, %v1456_v17 }
 0x35b   :  { %v827_v14 = vpack.c.b16 %v826_v3, %v826_v3  ;;  %1248 = vmatprep.subr.bf16.mxu1 %v1456_v17 }
 0x35c   :  { %v878_v18 = vpop.permute.xlu0 %877 }
 0x35d   :  { %1245 = vmatmul.mubr.msk.bf16.vlgmr.msra.gmra.mxu0 %vm497_vm8, %v827_v14  ;;  %v882_v12 = vrot.slane %v878_v18, %v1607_v33 }
 0x35e   :  { %1255 = vmatpush3.bf16.msra.mxu0 %v944_v16  ;;  %1256 = vmatprep.mubr.msk.bf16.mxu0 %vm1457_vm10, %v1456_v17 }
 0x35f   :  { %1266 = vmatprep.subr.bf16.mxu0 %v1456_v17  ;;  %v883_v15 = vpack.c.b16 %v882_v12, %v882_v12 }
 0x360   :  { %v934_v21 = vpop.permute.xlu0 %933 }
 0x361   :  { %v938_v10 = vrot.slane %v934_v21, %v1607_v33  ;;  %1239 = vmatmul.mubr.msk.bf16.vlgmr.msra.gmra.mxu1 %vm497_vm8, %v771_v7 }
 0x362   :  { %1249 = vmatpush3.bf16.msra.mxu1 %v888_v19  ;;  %1250 = vmatprep.mubr.msk.bf16.mxu1 %vm1457_vm10, %v1456_v17 }
 0x363   :  { %v939_v26 = vpack.c.b16 %v938_v10, %v938_v10  ;;  %1260 = vmatprep.subr.bf16.mxu1 %v1456_v17 }
 0x364   :  { %v990_v11 = vpop.permute.xlu0 %989 }
 0x365   :  { %1257 = vmatmul.mubr.msk.bf16.vlgmr.msra.gmra.mxu0 %vm497_vm8, %v939_v26  ;;  %v994_v25 = vrot.slane %v990_v11, %v1607_v33 }
 0x366   :  { %1267 = vmatpush3.bf16.msra.mxu0 %v1056_v9  ;;  %1268 = vmatprep.mubr.msk.bf16.mxu0 %vm1457_vm10, %v1456_v17 }
 0x367   :  { %v995_v29 = vpack.c.b16 %v994_v25, %v994_v25 }
 0x368   :  { %v1046_v2 = vpop.permute.xlu0 %1045 }
 0x369   :  { %v1050_v13 = vrot.slane %v1046_v2, %v1607_v33  ;;  %1251 = vmatmul.mubr.msk.bf16.vlgmr.msra.gmra.mxu1 %vm497_vm8, %v883_v15 }
 0x36a   :  { %1261 = vmatpush3.bf16.msra.mxu1 %v1000_v51  ;;  %1262 = vmatprep.mubr.msk.bf16.mxu1 %vm1457_vm10, %v1456_v17 }
 0x36b   :  { %v1051_v22 = vpack.c.b16 %v1050_v13, %v1050_v13 }
 0x36c   :  { %v576_v62 = vpop.permute.xlu0 %575 }
 0x36d   :  { %1269 = vmatmul.mubr.msk.bf16.vlgmr.msra.gmra.mxu0 %vm497_vm8, %v1051_v22  ;;  %v601_v27 = vrot.slane %v576_v62, %v1607_v33 }
 0x36f   :  { %v630_v52 = vsel %vm482_vm1, %v605_v20, %v601_v27 }
 0x370   :  { %v582_v30 = vpop.permute.xlu0 %581 }
 0x371   :  { %1263 = vmatmul.mubr.msk.bf16.vlgmr.msra.gmra.mxu1 %vm497_vm8, %v995_v29  ;;  %v609_v32 = vrot.slane %v582_v30, %v1607_v33 }
 0x373   :  { %v631_v36 = vsel %vm484_vm2, %v609_v32, %v630_v52 }
 0x374   :  { %v585_v24 = vpop.permute.xlu0 %584 }
 0x375   :  { %v613_v17 = vrot.slane %v585_v24, %v1607_v33 }
 0x377   :  { %v632_v28 = vsel %vm486_vm3, %v613_v17, %v631_v36 }
 0x378   :  { %v588_v6 = vpop.permute.xlu0 %587 }
 0x379   :  { %v617_v1 = vrot.slane %v588_v6, %v1607_v33 }
 0x37b   :  { %v633_v38 = vsel %vm488_vm4, %v617_v1, %v632_v28 }
 0x37c   :  { %v591_v34 = vpop.permute.xlu0 %590 }
 0x37d   :  { %v621_v23 = vrot.slane %v591_v34, %v1607_v33 }
 0x37f   :  { %v634_v40 = vsel %vm490_vm5, %v621_v23, %v633_v38 }
 0x380   :  { %v594_v37 = vpop.permute.xlu0 %593 }
 0x381   :  { %v625_v39 = vrot.slane %v594_v37, %v1607_v33 }
 0x383   :  { %v635_v41 = vsel %vm492_vm6, %v625_v39, %v634_v40 }
 0x384   :  { %v636_v0 = vsel %vm494_vm7, %v629_v4, %v635_v41 }
 0x385   :  { %v638_v42 = vsel %vm497_vm8, %v636_v0, 0.0 }
 0x386   :  { %639 = vadd.xlane.f32.xlu0 %v638_v42 }
 0x40f   :  { %v640_v43 = vpop.xlane.xlu0 %639 }
 0x410   :  { %v1099_v44 = vrot.slane %v640_v43, 1  ;;  %v1100_v47 = vrot.slane %v640_v43, 2  ;;  %v1101_v49 = vrot.slane %v640_v43, 3  ;;  %v1102_v33 = vrot.slane %v640_v43, 4 }
 0x411   :  { %v700_v45 = vpop.f32.mrf.mxu1  ;;  %v1103_v56 = vrot.slane %v640_v43, 5  ;;  %v1105_v59 = vrot.slane %v640_v43, 7  ;;  %v1104_v61 = vrot.slane %v640_v43, 6 }
 0x412   :  { %1324 = vrcp.f32 %v1099_v44 }
 0x413   :  { %v1228_v46 = vpop.f32.mrf.mxu1  ;;  %1326 = vrcp.f32 %v1100_v47 }
 0x414   :  { %1328 = vrcp.f32 %v640_v43 }
 0x415   :  { %v703_v48 = vpop.f32.mrf.mxu1  ;;  %1330 = vrcp.f32 %v1101_v49 }
 0x416   :  { %1332 = vrcp.f32 %v1102_v33 }
 0x417   :  { %v1229_v8 = vpop.f32.mrf.mxu1  ;;  %1334 = vrcp.f32 %v1103_v56 }
 0x418   :  { %1336 = vrcp.f32 %v1105_v59 }
 0x419   :  { %v756_v50 = vpop.f32.mrf.mxu1  ;;  %1338 = vrcp.f32 %v1104_v61 }
 0x41b   :  { %v1234_v53 = vpop.f32.mrf.mxu1 }
 0x41d   :  { %v759_v54 = vpop.f32.mrf.mxu1  ;;  %v868_v55 = vpop.f32.mrf.mxu0 }
 0x41f   :  { %v1235_v57 = vpop.f32.mrf.mxu1  ;;  %v1246_v58 = vpop.f32.mrf.mxu0 }
 0x420   :  { %v1325_v60 = vpop.eup %1324 }
 0x421   :  { %v812_v63 = vpop.f32.mrf.mxu1  ;;  %v871_v3 = vpop.f32.mrf.mxu0  ;;  %v1117_v5 = vmul.f32 %v1325_v60, %v756_v50 }
 0x422   :  { %v1327_v18 = vpop.eup %1326 }
 0x423   :  { %v1240_v14 = vpop.f32.mrf.mxu1  ;;  %v1247_v16 = vpop.f32.mrf.mxu0  ;;  %v1119_v10 = vmul.f32 %v1327_v18, %v812_v63  ;;  %v1138_v12 = vrot.slane %v1117_v5, 7 }
 0x424   :  { %v1329_v21 = vpop.eup %1328 }
 0x425   :  { %v815_v7 = vpop.f32.mrf.mxu1  ;;  %v980_v19 = vpop.f32.mrf.mxu0  ;;  %v1115_v51 = vmul.f32 %v1329_v21, %v700_v45  ;;  %v1140_v25 = vrot.slane %v1119_v10, 6 }
 0x426   :  { %v1331_v11 = vpop.eup %1330 }
 0x427   :  { %v1241_v26 = vpop.f32.mrf.mxu1  ;;  %v1258_v9 = vpop.f32.mrf.mxu0  ;;  %v1139_v62 = vsel %vm482_vm1, %v1138_v12, %v1115_v51  ;;  %v1121_v29 = vmul.f32 %v1331_v11, %v868_v55 }
 0x428   :  { %v1333_v15 = vpop.eup %1332  ;;  %v1141_v32 = vsel %vm484_vm2, %v1140_v25, %v1139_v62 }
 0x429   :  { %v924_v2 = vpop.f32.mrf.mxu1  ;;  %v983_v13 = vpop.f32.mrf.mxu0  ;;  %v1142_v17 = vrot.slane %v1121_v29, 5 }
 0x42a   :  { %v1123_v22 = vmul.f32 %v1333_v15, %v924_v2  ;;  %v1335_v27 = vpop.eup %1334 }
 0x42b   :  { %v1252_v30 = vpop.f32.mrf.mxu1  ;;  %v1259_v24 = vpop.f32.mrf.mxu0  ;;  %v1125_v34 = vmul.f32 %v1335_v27, %v980_v19  ;;  %v1143_v36 = vsel %vm486_vm3, %v1142_v17, %v1141_v32 }
 0x42c   :  { %v1144_v20 = vrot.slane %v1123_v22, 4  ;;  %v1337_v23 = vpop.eup %1336 }
 0x42d   :  { %v927_v6 = vpop.f32.mrf.mxu1  ;;  %v1092_v31 = vpop.f32.mrf.mxu0  ;;  %v1146_v40 = vrot.slane %v1125_v34, 3 }
 0x42e   :  { %v1339_v35 = vpop.eup %1338  ;;  %v1129_v28 = vmul.f32 %v1337_v23, %v1092_v31  ;;  %v1145_v39 = vsel %vm488_vm4, %v1144_v20, %v1143_v36 }
 0x42f   :  { %v1253_v1 = vpop.f32.mrf.mxu1  ;;  %v1270_v52 = vpop.f32.mrf.mxu0  ;;  %v1147_v44 = vsel %vm490_vm5, %v1146_v40, %v1145_v39 }
 0x430   :  { %v1150_v43 = vrot.slane %v1129_v28, 1 }
 0x431   :  { %v1036_v37 = vpop.f32.mrf.mxu1  ;;  %v1095_v38 = vpop.f32.mrf.mxu0 }
 0x432   :  { %v1127_v4 = vmul.f32 %v1339_v35, %v1036_v37 }
 0x433   :  { %v1264_v41 = vpop.f32.mrf.mxu1  ;;  %v1271_v0 = vpop.f32.mrf.mxu0 }
 0x434   :  { %v1148_v42 = vrot.slane %v1127_v4, 2 }
 0x435   :  { %v1039_v45 = vpop.f32.mrf.mxu1 }
 0x436   :  { %v1149_v46 = vsel %vm492_vm6, %v1148_v42, %v1147_v44 }
 0x437   :  { %v1265_v47 = vpop.f32.mrf.mxu1  ;;  %v1151_v48 = vsel %vm494_vm7, %v1150_v43, %v1149_v46 }
 0x438   :  { %1153 = vst.msk [vmem:[#allocation10] sm:$0xff] %vm117_vm0, %v1151_v48 }
 0x439   :  { %1431 = shalt.err (!%p1428_p10)
}
 0x43a   :  { %1163 = dma.vmem_to_hbm [thread:$0]  %s1161_s13, 128, %s1734_s5, [#allocation4]  }
 0x43b   :  { %1446 = dma.done.wait [#allocation4], 128  }
 0x43c   :  { %1447 = vsyncadd [#allocation4], 4294967168 }
 0x43d   :  { %1167 = vsyncpa [#allocation3], 1 }
 0x43e   :  { %1168 = vsyncpa [#allocation6], 1 }
 0x43f   :  { %1169 = vsyncpa [#allocation9], 1 }
 0x440   :  { %1170 = vsyncpa [#allocation4], 1 }

</bundles_post_ra>
